<compile_context>
chip_gen: v5e
topology: v5e:2x2
jax: 0.10.0
libtpu: 0.0.40
codegen_flags: <defaults>
</compile_context>

<pallas_src>
import functools

import jax
import jax.numpy as jnp
from jax.experimental import pallas as pl
from jax.experimental.pallas import tpu as pltpu

LANE = 128
SUBLANE = 8
SMALL_FALLBACK_ELEMS = 64 * 1024  # below this, plain fused XLA wins


def _round_up(v: int, m: int) -> int:
    return ((v + m - 1) // m) * m


def _chip_tuning():
    """(target_block_bytes_per_input, vmem_limit_bytes, min_grid_steps)."""
    kind = ""
    try:
        kind = jax.devices()[0].device_kind.lower()
    except Exception:
        pass
    if "v7" in kind or "7x" in kind:
        # 2 TensorCores/chip, 64 MiB VMEM/TC, ~3.2 TB/s HBM: 4 MiB blocks keep
        # per-step overhead small; force >= 4 steps so the parallel axis can
        # shard across both cores.
        return 4 * 1024 * 1024, 32 * 1024 * 1024, 4
    if "v5" in kind or "v6" in kind:
        # Single TensorCore, 128 MiB physical VMEM: bigger blocks, and no
        # forced multi-step split (it would be pure per-step overhead).
        return 8 * 1024 * 1024, 64 * 1024 * 1024, 1
    # Unknown chip: conservative defaults that are safe everywhere.
    return 4 * 1024 * 1024, 32 * 1024 * 1024, 1


def _exp_update_kernel(x_ref, s_ref, o_ref, *, alpha):
    # out = x * (1 - alpha) + state * alpha, computed in f32, cast back.
    xf = x_ref[...].astype(jnp.float32)
    sf = s_ref[...].astype(jnp.float32)
    o_ref[...] = (xf * (1.0 - alpha) + sf * alpha).astype(o_ref.dtype)


def _exp_update_2d(x2: jax.Array, s2: jax.Array, alpha: float,
                   donate_state: bool) -> jax.Array:
    rows, lane = x2.shape
    itemsize = jnp.dtype(x2.dtype).itemsize

    # dtype-native sublane packing: 8 (f32) / 16 (bf16) / 32 (int8, fp8).
    packing = max(1, 4 // itemsize)
    sublane = SUBLANE * packing

    target_bytes, vmem_limit, min_steps = _chip_tuning()
    target_rows = max(sublane,
                      (target_bytes // (lane * itemsize)) // sublane * sublane)

    if min_steps > 1 and rows > sublane * min_steps:
        # Multi-TC chip: keep at least `min_steps` blocks on the parallel axis
        # (capped at the target block size for large arrays).
        block_rows = max(sublane,
                         min(target_rows,
                             _round_up(pl.cdiv(rows, min_steps), sublane)))
    elif rows <= target_rows:
        # Whole array as one block (block_shape == full array dims is always
        # legal, even when `rows` is not a sublane multiple): grid of 1.
        block_rows = rows
    else:
        # Sublane-multiple block; a partial last block is masked by Pallas.
        block_rows = target_rows

    grid = (pl.cdiv(rows, block_rows),)
    kernel = functools.partial(_exp_update_kernel, alpha=alpha)

    return pl.pallas_call(
        kernel,
        out_shape=jax.ShapeDtypeStruct((rows, lane), x2.dtype),
        grid_spec=pltpu.PrefetchScalarGridSpec(
            num_scalar_prefetch=0,
            grid=grid,
            in_specs=[
                pl.BlockSpec((block_rows, lane), lambda i: (i, 0)),
                pl.BlockSpec((block_rows, lane), lambda i: (i, 0)),
            ],
            out_specs=pl.BlockSpec((block_rows, lane), lambda i: (i, 0)),
        ),
        compiler_params=pltpu.CompilerParams(
            dimension_semantics=("parallel",),
            vmem_limit_bytes=vmem_limit,
        ),
        input_output_aliases=({1: 0} if donate_state else {}),
    )(x2, s2)


def _lerp_ref(x: jax.Array, state: jax.Array, alpha: float) -> jax.Array:
    xf = x.astype(jnp.float32)
    sf = state.astype(jnp.float32)
    return (xf * (1.0 - alpha) + sf * alpha).astype(x.dtype)


def _exp_update_impl(x, state, alpha, min_pallas_elements, donate_state):
    n = x.size
    if n == 0 or n < min_pallas_elements or (n % LANE) != 0:
        # Tiny tensors: kernel launch + per-step overhead dwarfs the copy; let
        # XLA's fused elementwise op handle it.
        # Ragged tensors (n not a multiple of 128): a single fused XLA pass has
        # identical HBM traffic (2n read + n write) to the kernel and avoids
        # the pad / tail-concatenate extra pass flagged in review.
        return _lerp_ref(x, state, alpha)
    rows = n // LANE
    out2 = _exp_update_2d(x.reshape(rows, LANE), state.reshape(rows, LANE),
                          alpha, donate_state)
    return out2.reshape(x.shape)


_exp_update_jit = jax.jit(_exp_update_impl, static_argnums=(2, 3, 4))
_exp_update_jit_donated = jax.jit(_exp_update_impl, static_argnums=(2, 3, 4),
                                  donate_argnums=(1,))


def exponential_update(x: jax.Array, state: jax.Array, *, alpha: float,
                       donate_state: bool = False,
                       min_pallas_elements: int = SMALL_FALLBACK_ELEMS
                       ) -> jax.Array:
    assert x.shape == state.shape, "x and state must have identical shapes"
    assert x.dtype == state.dtype, "x and state must have identical dtypes"
    alpha = float(alpha)  # constructor constant in the PyTorch module
    fn = _exp_update_jit_donated if donate_state else _exp_update_jit
    return fn(x, state, alpha, int(min_pallas_elements), bool(donate_state))


if __name__ == "__main__":
    key = jax.random.PRNGKey(0)
    k1, k2, k3, k4, k5, k6 = jax.random.split(key, 6)
    alpha = 0.9  # deterministic module "parameter" (constructor arg)

    # Small NCHW input consistent with typical conv-model state tracking.
    B, C, H, W = 2, 4, 16, 16
    x = jax.random.normal(k1, (B, C, H, W), dtype=jnp.float32)
    state = jax.random.normal(k2, (B, C, H, W), dtype=jnp.float32)
    ref = x * (1.0 - alpha) + state * alpha

    # 1) Force the Pallas path at this small size to validate the kernel itself.
    out = jax.block_until_ready(
        exponential_update(x, state, alpha=alpha, min_pallas_elements=0))
    assert jnp.allclose(out, ref, atol=1e-6, rtol=1e-6), "pallas path mismatch"

    # 2) Default dispatch: tiny tensor -> fused XLA fallback.
    out_d = jax.block_until_ready(exponential_update(x, state, alpha=alpha))
    assert jnp.allclose(out_d, ref, atol=1e-6, rtol=1e-6), "fallback mismatch"

    # 3) bf16 exercises the dtype-aware sublane rounding in the kernel path.
    xb, sb = x.astype(jnp.bfloat16), state.astype(jnp.bfloat16)
    out_b = jax.block_until_ready(
        exponential_update(xb, sb, alpha=alpha, min_pallas_elements=0))
    ref_b = (xb.astype(jnp.float32) * (1.0 - alpha)
             + sb.astype(jnp.float32) * alpha).astype(jnp.bfloat16)
    assert jnp.allclose(out_b.astype(jnp.float32), ref_b.astype(jnp.float32),
                        atol=5e-2, rtol=5e-2), "bf16 mismatch"

    # 4) Ragged element count (not a multiple of 128) -> single fused XLA pass.
    xr = jax.random.normal(k3, (3, 5, 7, 11), dtype=jnp.float32)
    sr = jax.random.normal(k4, (3, 5, 7, 11), dtype=jnp.float32)
    out_r = jax.block_until_ready(exponential_update(xr, sr, alpha=alpha))
    ref_r = xr * (1.0 - alpha) + sr * alpha
    assert jnp.allclose(out_r, ref_r, atol=1e-6, rtol=1e-6), "ragged mismatch"

    # 5) Real buffer donation: outer jit donates `state`, kernel aliases it.
    xd = jax.random.normal(k5, (B, C, H, W), dtype=jnp.float32)
    sd = jax.random.normal(k6, (B, C, H, W), dtype=jnp.float32)
    ref_dn = xd * (1.0 - alpha) + sd * alpha
    out_dn = jax.block_until_ready(
        exponential_update(xd, sd, alpha=alpha, donate_state=True,
                           min_pallas_elements=0))
    assert jnp.allclose(out_dn, ref_dn, atol=1e-6, rtol=1e-6), "donate mismatch"
    # NOTE: `sd` is donated above and must not be used after this point.

    print("KERNEL_OK")
</pallas_src>

<mosaic_0001>
module attributes {stable_mosaic.version = 11 : i64} {
  func.func @_exp_update_kernel(%arg0: i32, %arg1: memref<16x128xf32, #tpu.memory_space<vmem>>, %arg2: memref<16x128xf32, #tpu.memory_space<vmem>>, %arg3: memref<16x128xf32, #tpu.memory_space<vmem>>) attributes {dimension_semantics = [#tpu.dimension_semantics<parallel>], iteration_bounds = array<i64: 1>, scalar_prefetch = 0 : i64, scratch_operands = 0 : i64, tpu.core_type = #tpu.core_type<tc>, window_params = [{transform_indices = @transform_0, window_bounds = array<i64: 16, 128>}, {transform_indices = @transform_1, window_bounds = array<i64: 16, 128>}, {transform_indices = @transform_2, window_bounds = array<i64: 16, 128>}]} {
    %c0 = arith.constant 0 : index
    %c0_0 = arith.constant 0 : index
    %0 = vector.load %arg1[%c0, %c0_0] : memref<16x128xf32, #tpu.memory_space<vmem>>, vector<16x128xf32>
    %c0_1 = arith.constant 0 : index
    %c0_2 = arith.constant 0 : index
    %1 = vector.load %arg2[%c0_1, %c0_2] : memref<16x128xf32, #tpu.memory_space<vmem>>, vector<16x128xf32>
    %cst = arith.constant 1.000000e-01 : f32
    %2 = vector.broadcast %cst : f32 to vector<16x128xf32>
    %3 = arith.mulf %0, %2 : vector<16x128xf32>
    %cst_3 = arith.constant 0.899999976 : f32
    %4 = vector.broadcast %cst_3 : f32 to vector<16x128xf32>
    %5 = arith.mulf %1, %4 : vector<16x128xf32>
    %6 = arith.addf %3, %5 : vector<16x128xf32>
    %c0_4 = arith.constant 0 : index
    %c0_5 = arith.constant 0 : index
    %7 = vector.load %arg3[%c0_4, %c0_5] : memref<16x128xf32, #tpu.memory_space<vmem>>, vector<16x128xf32>
    tpu.vector_store %arg3[%c0_4, %c0_5], %6 {strides = array<i32>} : memref<16x128xf32, #tpu.memory_space<vmem>>, vector<16x128xf32>,
    return
  }
  func.func @transform_0(%arg0: i32) -> (i32, i32) {
    %c0_i32 = arith.constant 0 : i32
    %c0_i32_0 = arith.constant 0 : i32
    return %arg0, %c0_i32 : i32, i32
  }
  func.func @transform_1(%arg0: i32) -> (i32, i32) {
    %c0_i32 = arith.constant 0 : i32
    %c0_i32_0 = arith.constant 0 : i32
    return %arg0, %c0_i32 : i32, i32
  }
  func.func @transform_2(%arg0: i32) -> (i32, i32) {
    %c0_i32 = arith.constant 0 : i32
    %c0_i32_0 = arith.constant 0 : i32
    return %arg0, %c0_i32 : i32, i32
  }
}

</mosaic_0001>

<bundles_post_ra>
// kernel: _exp_update_impl.1
= control target key start
LH: loop header
LB: loop body
LE: loop exit
PB: predicated region body
PF: predicated region fallthrough
CT: control target
= control target key end

     0   :  { %s60_s0 = inlined_call_operand.vmem [shape: f32[16,128], index: 0, kind: input, shape index: {}]   ;;  %s61_s1 = inlined_call_operand.vmem [shape: f32[16,128], index: 1, kind: input, shape index: {}]   ;;  %s62_s2 = inlined_call_operand.vmem [shape: f32[16,128], index: 2, kind: output, shape index: {}]  }
   0x1   :  { %v11_v0 = vld [vmem:[%s60_s0] sm:$0xff]  ;;  %v12_v2 = vld [vmem:[%s60_s0 + $0x8] sm:$0xff] }
   0x2   :  { %v13_v1 = vld [vmem:[%s61_s1] sm:$0xff]  ;;  %v15_v3 = vmul.f32 0.1, %v11_v0  ;;  %v14_v5 = vld [vmem:[%s61_s1 + $0x8] sm:$0xff]  ;;  %v16_v6 = vmul.f32 0.1, %v12_v2 }
   0x3   :  { %v17_v4 = vmul.f32 0.9, %v13_v1  ;;  %v18_v7 = vmul.f32 0.9, %v14_v5 }
   0x5   :  { %v19_v8 = vadd.f32 %v17_v4, %v15_v3  ;;  %v20_v9 = vadd.f32 %v18_v7, %v16_v6 }
   0x7   :  { %21 = vst [vmem:[%s62_s2] sm:$0xff] %v19_v8 }
   0x8   :  { %22 = vst [vmem:[%s62_s2 + $0x8] sm:$0xff] %v20_v9 }

</bundles_post_ra>
